<compile_context>
chip_gen: v7x
topology: tpu7x:2x2x1
jax: 0.10.0
libtpu: 0.0.40
codegen_flags: <defaults>
</compile_context>

<pallas_src>
import math

import jax
import jax.numpy as jnp
from jax.experimental import pallas as pl
from jax.experimental.pallas import tpu as pltpu


def _round_up(x, m):
    return (x + m - 1) // m * m


# ------------------------------------------------------------------ kernel ---

def _mlp_kernel(x_ref, w1_ref, b1_ref, w2_ref, b2_ref, w3_ref, b3_ref, o_ref):
    """One batch tile of the fused 3-layer MLP.

    x_ref  : (TB, Dp)            activations in their native dtype
    w1_ref : (Dp, H)             layer-1 weight (compute dtype)
    b1_ref : (1, H)      f32     layer-1 bias
    w2_ref : (H, P)              layer-2 weight, zero-padded 50 -> P
    b2_ref : (1, P)      f32     layer-2 bias, zero-padded
    w3_ref : (1, P)      f32     layer-3 weight as a padded lane row
    b3_ref : (1, 1) SMEM f32     layer-3 bias (scalar)
    o_ref  : (TB, 1)     f32     per-row scores (no lane relayout needed)
    """
    # In-kernel cast of the streamed operand (VPU) -> no extra HBM copy of x.
    x = x_ref[...].astype(w1_ref.dtype)

    # Layer 1: Linear + ReLU (MXU matmul, f32 accumulation, f32 epilogue).
    h1 = jnp.dot(x, w1_ref[...], preferred_element_type=jnp.float32)
    h1 = jnp.maximum(h1 + b1_ref[...], 0.0)

    # Layer 2: Linear + ReLU. Padded columns of w2/b2 are zero, so the padded
    # lanes of h2 come out exactly 0 after the ReLU.
    h2 = jnp.dot(h1.astype(w2_ref.dtype), w2_ref[...],
                 preferred_element_type=jnp.float32)
    h2 = jnp.maximum(h2 + b2_ref[...], 0.0)

    # Layer 3: Linear(50 -> 1) as a VPU/XLU lane reduction against the padded
    # weight row. keepdims=True keeps the result sublane-major so the (TB, 1)
    # store needs no sublane->lane relayout.
    score = jnp.sum(h2 * w3_ref[...], axis=-1, keepdims=True) + b3_ref[0, 0]
    o_ref[...] = score.astype(o_ref.dtype)


# --------------------------------------------------------------- chip info ---

def _chip_vmem_and_cores():
    """(usable scoped-VMEM budget in bytes, TensorCores per chip).

    v7x: 64 MiB VMEM / 2 TCs per chip; v5e/v6e: 128 MiB / 1 TC."""
    vmem_bytes = 128 << 20
    num_tc = 1
    try:
        info = pltpu.get_tpu_info()
        vmem_bytes = int(getattr(info, "vmem_capacity_bytes", vmem_bytes))
    except Exception:
        pass
    try:
        kind = jax.devices()[0].device_kind.lower()
    except Exception:
        kind = ""
    if "7" in kind:                       # e.g. "tpu7x"
        num_tc = 2
        vmem_bytes = min(vmem_bytes, 64 << 20)
    # Leave ~25% headroom for compiler-internal scratch / staging.
    return (vmem_bytes * 3) // 4, num_tc


def _weight_vmem_bytes(prepared):
    """Approximate single-buffer VMEM footprint of the resident parameter
    blocks ((8,128)-tile padded)."""
    total = 0
    for name in ("w1", "b1", "w2", "b2", "w3"):
        a = prepared[name]
        r = _round_up(a.shape[0], 8)
        c = _round_up(a.shape[1], 128)
        total += r * c * jnp.dtype(a.dtype).itemsize
    return total


def _pick_block_rows(batch, d_in_pad, hidden, x_itemsize, weight_vmem,
                     vmem_usable, num_tc, target_rows=4096):
    """Batch-tile rows: big enough to amortize the ~0.35us per-grid-step cost
    (target ~4k rows at small d_in), capped by what fits in scoped VMEM next to
    the resident weights, and split so v7x's two TensorCores both get work."""
    b128 = _round_up(max(batch, 1), 128)
    per_row = (2 * d_in_pad * x_itemsize       # double-buffered x tile
               + (hidden + 128) * 4            # h1 / h2 live f32 values
               + 2 * 128 * 4)                  # double-buffered (tb,1) out (lane-padded)
    avail = vmem_usable - weight_vmem - (4 << 20)
    max_rows = max(128, (avail // per_row) // 128 * 128)
    tb = max(128, min(target_rows, max_rows, b128))
    if num_tc >= 2 and tb >= b128 and b128 >= 256:
        # One tile would leave the second TensorCore idle -> split into two.
        tb = _round_up(b128 // 2, 128)
    return tb


# ----------------------------------------------------------------- wrapper ---

def evidence_ranker_forward(x, prepared, *, block_rows=None):
    """x: (B, sizeInput) in its native dtype. prepared: prepare_params(...).
    Returns (B, 1) float32 scores."""
    w1, b1 = prepared["w1"], prepared["b1"]
    w2, b2 = prepared["w2"], prepared["b2"]
    w3, b3 = prepared["w3"], prepared["b3"]
    d_in, d_in_pad = prepared["d_in"], prepared["d_in_pad"]
    hidden = w1.shape[1]

    B = x.shape[0]
    assert x.shape[1] == d_in, (x.shape, d_in)

    vmem_usable, num_tc = _chip_vmem_and_cores()
    x_itemsize = jnp.dtype(x.dtype).itemsize
    weight_vmem = _weight_vmem_bytes(prepared)

    if block_rows is None:
        tb = _pick_block_rows(B, d_in_pad, hidden, x_itemsize, weight_vmem,
                              vmem_usable, num_tc)
    else:
        tb = _round_up(block_rows, 128)

    b_pad = _round_up(max(B, 1), tb)
    num_tiles = b_pad // tb

    # Pad batch rows to a tile multiple and input columns to the aligned width
    # (zero padding is numerically inert: padded w1 rows are zero, padded batch
    # rows are stripped from the output).
    pad_rows, pad_cols = b_pad - B, d_in_pad - d_in
    if pad_rows or pad_cols:
        x = jnp.pad(x, ((0, pad_rows), (0, pad_cols)))

    # Footprint-derived scoped-VMEM limit and a cost estimate for XLA.
    x_tile_bytes = tb * d_in_pad * x_itemsize
    out_tile_bytes = tb * 128 * 4                 # (tb,1) block lane-pads to 128
    act_bytes = tb * (hidden + 128) * 4

    flops = 2 * b_pad * (d_in_pad * hidden + hidden * 128) + 4 * b_pad * 128
    bytes_accessed = (b_pad * d_in_pad * x_itemsize + b_pad * 4
                      + sum(int(a.size) * jnp.dtype(a.dtype).itemsize
                            for a in (w1, b1, w2, b2, w3, b3)))
    cost = pl.CostEstimate(flops=int(flops), transcendentals=0,
                           bytes_accessed=int(bytes_accessed))

    def run(single_buffer_weights):
        if single_buffer_weights:
            # Constant index_map -> DMA'd once; one buffer is enough.
            resident = lambda a: pl.BlockSpec(
                a.shape, lambda *_: (0,) * a.ndim,
                pipeline_mode=pl.Buffered(buffer_count=1))
            weight_bufs = 1
        else:
            resident = lambda a: pl.BlockSpec(a.shape, lambda *_: (0,) * a.ndim)
            weight_bufs = 2
        footprint = (weight_bufs * weight_vmem + 2 * x_tile_bytes
                     + 2 * out_tile_bytes + act_bytes)
        vmem_limit = int(min(vmem_usable, footprint + (16 << 20)))

        return pl.pallas_call(
            _mlp_kernel,
            out_shape=jax.ShapeDtypeStruct((b_pad, 1), jnp.float32),
            grid=(num_tiles,),
            in_specs=[
                pl.BlockSpec((tb, d_in_pad), lambda i: (i, 0)),       # x: batch-tiled
                resident(w1), resident(b1),
                resident(w2), resident(b2),
                resident(w3),
                pl.BlockSpec(memory_space=pltpu.MemorySpace.SMEM),    # b3 scalar
            ],
            out_specs=pl.BlockSpec((tb, 1), lambda i: (i, 0)),
            compiler_params=pltpu.CompilerParams(
                dimension_semantics=("parallel",),                    # megacore on v7x
                vmem_limit_bytes=vmem_limit,
            ),
            cost_estimate=cost,
        )(x, w1, b1, w2, b2, w3, b3)

    try:
        out = run(single_buffer_weights=True)
        out.block_until_ready()
    except Exception:
        # Fallback if this JAX build rejects Buffered(1) on resident operands.
        out = run(single_buffer_weights=False)

    return out[:B]


# ------------------------------------------------------------ params / init ---

def _xavier_uniform(key, fan_in, fan_out):
    """Matches nn.init.xavier_uniform_ (gain=1); sampled directly in (in, out)."""
    limit = math.sqrt(6.0 / (fan_in + fan_out))
    return jax.random.uniform(key, (fan_in, fan_out), jnp.float32, -limit, limit)


def _linear_bias(key, fan_in, fan_out):
    """PyTorch default Linear bias init: U(-1/sqrt(fan_in), 1/sqrt(fan_in))."""
    bound = 1.0 / math.sqrt(fan_in)
    return jax.random.uniform(key, (1, fan_out), jnp.float32, -bound, bound)


def init_evidence_ranker_params(key, size_input, hidden_dimension):
    """Logical (unpadded) parameters, already transposed to (in, out) layout."""
    k = jax.random.split(key, 6)
    return {
        "w1": _xavier_uniform(k[0], size_input, hidden_dimension),
        "b1": _linear_bias(k[1], size_input, hidden_dimension),
        "w2": _xavier_uniform(k[2], hidden_dimension, 50),
        "b2": _linear_bias(k[3], hidden_dimension, 50),
        "w3": _xavier_uniform(k[4], 50, 1),
        "b3": _linear_bias(k[5], 50, 1),
    }


def prepare_params(params, compute_dtype=jnp.bfloat16, pad_input_dim=True):
    """One-time packing for the kernel.

    * Zero-pads the 50-wide layer-2/3 dim to 128 and lays layer-3's weight out
      as a lane row (padding is inert: padded h2 lanes are ReLU(0)=0 and the
      padded w3 lanes are 0).
    * Optionally zero-pads the input dim to a multiple of 128 so streamed x
      tiles and the MXU K feed are lane-aligned (set pad_input_dim=False when
      d_in is tiny and the extra streamed bytes would dominate).
    * Defaults to bfloat16 matmul operands (accumulation and epilogues stay
      f32); pass compute_dtype=jnp.float32 for a bit-faithful reference check.
    """
    d_in, hidden = params["w1"].shape
    n2 = params["w2"].shape[1]                          # 50
    p = _round_up(n2, 128)
    d_in_pad = _round_up(d_in, 128) if pad_input_dim else d_in

    w1p = jnp.zeros((d_in_pad, hidden), jnp.float32).at[:d_in, :].set(params["w1"])
    w2p = jnp.zeros((hidden, p), jnp.float32).at[:, :n2].set(params["w2"])
    b2p = jnp.zeros((1, p), jnp.float32).at[:, :n2].set(params["b2"])
    w3row = jnp.zeros((1, p), jnp.float32).at[:, :n2].set(params["w3"][:, 0])

    return {
        "w1": w1p.astype(compute_dtype),
        "b1": params["b1"].astype(jnp.float32),
        "w2": w2p.astype(compute_dtype),
        "b2": b2p.astype(jnp.float32),
        "w3": w3row.astype(jnp.float32),                # layer-3 reduction in f32
        "b3": params["b3"].astype(jnp.float32),         # (1, 1) -> SMEM scalar
        "d_in": d_in,
        "d_in_pad": d_in_pad,
    }


def _reference_forward(x, params):
    h1 = jnp.maximum(x @ params["w1"] + params["b1"], 0.0)
    h2 = jnp.maximum(h1 @ params["w2"] + params["b2"], 0.0)
    return h2 @ params["w3"] + params["b3"]


# -------------------------------------------------------------------- main ---

if __name__ == "__main__":
    size_input = 32
    hidden_dimension = 64
    batch = 8

    key = jax.random.PRNGKey(0)
    k_params, k_x = jax.random.split(key)

    params = init_evidence_ranker_params(k_params, size_input, hidden_dimension)
    x = jax.random.normal(k_x, (batch, size_input), jnp.float32)
    ref = _reference_forward(x, params)

    # 1) f32 path: tight check against the pure-JAX reference.
    prep_f32 = prepare_params(params, compute_dtype=jnp.float32)
    out_f32 = jax.block_until_ready(evidence_ranker_forward(x, prep_f32))
    assert out_f32.shape == (batch, 1), out_f32.shape
    assert jnp.allclose(out_f32, ref, atol=1e-3, rtol=1e-3), (
        "f32 Pallas output mismatch vs reference, max abs err = "
        f"{jnp.max(jnp.abs(out_f32 - ref))}")

    # 2) Default bf16 path (HBM-traffic optimized): looser tolerance since the
    #    matmul operands are bf16 (accumulation stays f32).
    prep_bf16 = prepare_params(params)
    out_bf16 = jax.block_until_ready(evidence_ranker_forward(x, prep_bf16))
    assert out_bf16.shape == (batch, 1), out_bf16.shape
    assert jnp.allclose(out_bf16, ref, atol=5e-2, rtol=5e-2), (
        "bf16 Pallas output mismatch vs reference, max abs err = "
        f"{jnp.max(jnp.abs(out_bf16 - ref))}")

    print("KERNEL_OK")
</pallas_src>

<mosaic_0001>
module attributes {stable_mosaic.version = 11 : i64} {
  func.func @_mlp_kernel(%arg0: i32, %arg1: memref<128x128xf32, #tpu.memory_space<vmem>>, %arg2: memref<128x64xf32, #tpu.memory_space<vmem>>, %arg3: memref<1x64xf32, #tpu.memory_space<vmem>>, %arg4: memref<64x128xf32, #tpu.memory_space<vmem>>, %arg5: memref<1x128xf32, #tpu.memory_space<vmem>>, %arg6: memref<1x128xf32, #tpu.memory_space<vmem>>, %arg7: memref<1x1xf32, #tpu.memory_space<smem>>, %arg8: memref<128x1xf32, #tpu.memory_space<vmem>>) attributes {dimension_semantics = [#tpu.dimension_semantics<parallel>], iteration_bounds = array<i64: 1>, scalar_prefetch = 0 : i64, scratch_operands = 0 : i64, tpu.core_type = #tpu.core_type<tc>, window_params = [{transform_indices = @transform_0, window_bounds = array<i64: 128, 128>}, {pipeline_mode = #tpu.pipeline_mode<synchronous>, transform_indices = @transform_1, window_bounds = array<i64: 128, 64>}, {pipeline_mode = #tpu.pipeline_mode<synchronous>, transform_indices = @transform_2, window_bounds = array<i64: 1, 64>}, {pipeline_mode = #tpu.pipeline_mode<synchronous>, transform_indices = @transform_3, window_bounds = array<i64: 64, 128>}, {pipeline_mode = #tpu.pipeline_mode<synchronous>, transform_indices = @transform_4, window_bounds = array<i64: 1, 128>}, {pipeline_mode = #tpu.pipeline_mode<synchronous>, transform_indices = @transform_5, window_bounds = array<i64: 1, 128>}, {transform_indices = @transform_6, window_bounds = array<i64: 1, 1>}, {transform_indices = @transform_7, window_bounds = array<i64: 128, 1>}]} {
    %c0 = arith.constant 0 : index
    %c0_0 = arith.constant 0 : index
    %0 = vector.load %arg1[%c0, %c0_0] : memref<128x128xf32, #tpu.memory_space<vmem>>, vector<128x128xf32>
    %c0_1 = arith.constant 0 : index
    %c0_2 = arith.constant 0 : index
    %1 = vector.load %arg2[%c0_1, %c0_2] : memref<128x64xf32, #tpu.memory_space<vmem>>, vector<128x64xf32>
    %cst = arith.constant dense<0.000000e+00> : vector<128x64xf32>
    %2 = tpu.matmul %0, %1, %cst {dimension_numbers = #tpu.dot_dimension_numbers<[1], [0], [0], [1], [0, 0, 1, 1], [], []>} : vector<128x128xf32>, vector<128x64xf32>, vector<128x64xf32> -> vector<128x64xf32>
    %c0_3 = arith.constant 0 : index
    %c0_4 = arith.constant 0 : index
    %3 = vector.load %arg3[%c0_3, %c0_4] : memref<1x64xf32, #tpu.memory_space<vmem>>, vector<1x64xf32>
    %4 = vector.broadcast %3 : vector<1x64xf32> to vector<128x64xf32>
    %5 = arith.addf %2, %4 : vector<128x64xf32>
    %cst_5 = arith.constant 0.000000e+00 : f32
    %6 = vector.broadcast %cst_5 : f32 to vector<128x64xf32>
    %7 = arith.maximumf %5, %6 : vector<128x64xf32>
    %c0_6 = arith.constant 0 : index
    %c0_7 = arith.constant 0 : index
    %8 = vector.load %arg4[%c0_6, %c0_7] : memref<64x128xf32, #tpu.memory_space<vmem>>, vector<64x128xf32>
    %cst_8 = arith.constant dense<0.000000e+00> : vector<128x128xf32>
    %9 = tpu.matmul %7, %8, %cst_8 {dimension_numbers = #tpu.dot_dimension_numbers<[1], [0], [0], [1], [0, 0, 1, 1], [], []>} : vector<128x64xf32>, vector<64x128xf32>, vector<128x128xf32> -> vector<128x128xf32>
    %c0_9 = arith.constant 0 : index
    %c0_10 = arith.constant 0 : index
    %10 = vector.load %arg5[%c0_9, %c0_10] : memref<1x128xf32, #tpu.memory_space<vmem>>, vector<1x128xf32>
    %11 = vector.broadcast %10 : vector<1x128xf32> to vector<128x128xf32>
    %12 = arith.addf %9, %11 : vector<128x128xf32>
    %cst_11 = arith.constant 0.000000e+00 : f32
    %13 = vector.broadcast %cst_11 : f32 to vector<128x128xf32>
    %14 = arith.maximumf %12, %13 : vector<128x128xf32>
    %c0_12 = arith.constant 0 : index
    %c0_13 = arith.constant 0 : index
    %15 = vector.load %arg6[%c0_12, %c0_13] : memref<1x128xf32, #tpu.memory_space<vmem>>, vector<1x128xf32>
    %16 = vector.broadcast %15 : vector<1x128xf32> to vector<128x128xf32>
    %17 = arith.mulf %14, %16 : vector<128x128xf32>
    %cst_14 = arith.constant dense<0.000000e+00> : vector<128xf32>
    %18 = vector.multi_reduction <add>, %17, %cst_14 [1] : vector<128x128xf32> to vector<128xf32>
    %19 = vector.shape_cast %18 : vector<128xf32> to vector<128x1xf32>
    %c0_15 = arith.constant 0 : index
    %c0_16 = arith.constant 0 : index
    %20 = memref.load %arg7[%c0_15, %c0_16] : memref<1x1xf32, #tpu.memory_space<smem>>
    %21 = vector.broadcast %20 : f32 to vector<128x1xf32>
    %22 = arith.addf %19, %21 : vector<128x1xf32>
    %c0_17 = arith.constant 0 : index
    %c0_18 = arith.constant 0 : index
    %23 = vector.load %arg8[%c0_17, %c0_18] : memref<128x1xf32, #tpu.memory_space<vmem>>, vector<128x1xf32>
    tpu.vector_store %arg8[%c0_17, %c0_18], %22 {strides = array<i32>} : memref<128x1xf32, #tpu.memory_space<vmem>>, vector<128x1xf32>,
    return
  }
  func.func @transform_0(%arg0: i32) -> (i32, i32) {
    %c0_i32 = arith.constant 0 : i32
    %c0_i32_0 = arith.constant 0 : i32
    return %arg0, %c0_i32 : i32, i32
  }
  func.func @transform_1(%arg0: i32) -> (i32, i32) {
    %c0_i32 = arith.constant 0 : i32
    %c0_i32_0 = arith.constant 0 : i32
    %c0_i32_1 = arith.constant 0 : i32
    return %c0_i32, %c0_i32_0 : i32, i32
  }
  func.func @transform_2(%arg0: i32) -> (i32, i32) {
    %c0_i32 = arith.constant 0 : i32
    %c0_i32_0 = arith.constant 0 : i32
    %c0_i32_1 = arith.constant 0 : i32
    return %c0_i32, %c0_i32_0 : i32, i32
  }
  func.func @transform_3(%arg0: i32) -> (i32, i32) {
    %c0_i32 = arith.constant 0 : i32
    %c0_i32_0 = arith.constant 0 : i32
    %c0_i32_1 = arith.constant 0 : i32
    return %c0_i32, %c0_i32_0 : i32, i32
  }
  func.func @transform_4(%arg0: i32) -> (i32, i32) {
    %c0_i32 = arith.constant 0 : i32
    %c0_i32_0 = arith.constant 0 : i32
    %c0_i32_1 = arith.constant 0 : i32
    return %c0_i32, %c0_i32_0 : i32, i32
  }
  func.func @transform_5(%arg0: i32) -> (i32, i32) {
    %c0_i32 = arith.constant 0 : i32
    %c0_i32_0 = arith.constant 0 : i32
    %c0_i32_1 = arith.constant 0 : i32
    return %c0_i32, %c0_i32_0 : i32, i32
  }
  func.func @transform_6(%arg0: i32) -> (i32, i32) {
    %c0_i32 = arith.constant 0 : i32
    %c0_i32_0 = arith.constant 0 : i32
    %c0_i32_1 = arith.constant 0 : i32
    return %c0_i32, %c0_i32_0 : i32, i32
  }
  func.func @transform_7(%arg0: i32) -> (i32, i32) {
    %c0_i32 = arith.constant 0 : i32
    %c0_i32_0 = arith.constant 0 : i32
    return %arg0, %c0_i32 : i32, i32
  }
}

module attributes {stable_mosaic.version = 11 : i64} {
  func.func @_mlp_kernel(%arg0: i32, %arg1: memref<128x128xf32, #tpu.memory_space<vmem>>, %arg2: memref<128x64xf32, #tpu.memory_space<vmem>>, %arg3: memref<1x64xf32, #tpu.memory_space<vmem>>, %arg4: memref<64x128xf32, #tpu.memory_space<vmem>>, %arg5: memref<1x128xf32, #tpu.memory_space<vmem>>, %arg6: memref<1x128xf32, #tpu.memory_space<vmem>>, %arg7: memref<1x1xf32, #tpu.memory_space<smem>>, %arg8: memref<128x1xf32, #tpu.memory_space<vmem>>) attributes {dimension_semantics = [#tpu.dimension_semantics<parallel>], iteration_bounds = array<i64: 1>, scalar_prefetch = 0 : i64, scratch_operands = 0 : i64, tpu.core_type = #tpu.core_type<tc>, window_params = [{transform_indices = @transform_0, window_bounds = array<i64: 128, 128>}, {pipeline_mode = #tpu.pipeline_mode<synchronous>, transform_indices = @transform_1, window_bounds = array<i64: 128, 64>}, {pipeline_mode = #tpu.pipeline_mode<synchronous>, transform_indices = @transform_2, window_bounds = array<i64: 1, 64>}, {pipeline_mode = #tpu.pipeline_mode<synchronous>, transform_indices = @transform_3, window_bounds = array<i64: 64, 128>}, {pipeline_mode = #tpu.pipeline_mode<synchronous>, transform_indices = @transform_4, window_bounds = array<i64: 1, 128>}, {pipeline_mode = #tpu.pipeline_mode<synchronous>, transform_indices = @transform_5, window_bounds = array<i64: 1, 128>}, {transform_indices = @transform_6, window_bounds = array<i64: 1, 1>}, {transform_indices = @transform_7, window_bounds = array<i64: 128, 1>}]} {
    %c0 = arith.constant 0 : index
    %c0_0 = arith.constant 0 : index
    %0 = vector.load %arg1[%c0, %c0_0] : memref<128x128xf32, #tpu.memory_space<vmem>>, vector<128x128xf32>
    %c0_1 = arith.constant 0 : index
    %c0_2 = arith.constant 0 : index
    %1 = vector.load %arg2[%c0_1, %c0_2] : memref<128x64xf32, #tpu.memory_space<vmem>>, vector<128x64xf32>
    %cst = arith.constant dense<0.000000e+00> : vector<128x64xf32>
    %2 = tpu.matmul %0, %1, %cst {dimension_numbers = #tpu.dot_dimension_numbers<[1], [0], [0], [1], [0, 0, 1, 1], [], []>} : vector<128x128xf32>, vector<128x64xf32>, vector<128x64xf32> -> vector<128x64xf32>
    %c0_3 = arith.constant 0 : index
    %c0_4 = arith.constant 0 : index
    %3 = vector.load %arg3[%c0_3, %c0_4] : memref<1x64xf32, #tpu.memory_space<vmem>>, vector<1x64xf32>
    %4 = vector.broadcast %3 : vector<1x64xf32> to vector<128x64xf32>
    %5 = arith.addf %2, %4 : vector<128x64xf32>
    %cst_5 = arith.constant 0.000000e+00 : f32
    %6 = vector.broadcast %cst_5 : f32 to vector<128x64xf32>
    %7 = arith.maximumf %5, %6 : vector<128x64xf32>
    %c0_6 = arith.constant 0 : index
    %c0_7 = arith.constant 0 : index
    %8 = vector.load %arg4[%c0_6, %c0_7] : memref<64x128xf32, #tpu.memory_space<vmem>>, vector<64x128xf32>
    %cst_8 = arith.constant dense<0.000000e+00> : vector<128x128xf32>
    %9 = tpu.matmul %7, %8, %cst_8 {dimension_numbers = #tpu.dot_dimension_numbers<[1], [0], [0], [1], [0, 0, 1, 1], [], []>} : vector<128x64xf32>, vector<64x128xf32>, vector<128x128xf32> -> vector<128x128xf32>
    %c0_9 = arith.constant 0 : index
    %c0_10 = arith.constant 0 : index
    %10 = vector.load %arg5[%c0_9, %c0_10] : memref<1x128xf32, #tpu.memory_space<vmem>>, vector<1x128xf32>
    %11 = vector.broadcast %10 : vector<1x128xf32> to vector<128x128xf32>
    %12 = arith.addf %9, %11 : vector<128x128xf32>
    %cst_11 = arith.constant 0.000000e+00 : f32
    %13 = vector.broadcast %cst_11 : f32 to vector<128x128xf32>
    %14 = arith.maximumf %12, %13 : vector<128x128xf32>
    %c0_12 = arith.constant 0 : index
    %c0_13 = arith.constant 0 : index
    %15 = vector.load %arg6[%c0_12, %c0_13] : memref<1x128xf32, #tpu.memory_space<vmem>>, vector<1x128xf32>
    %16 = vector.broadcast %15 : vector<1x128xf32> to vector<128x128xf32>
    %17 = arith.mulf %14, %16 : vector<128x128xf32>
    %cst_14 = arith.constant dense<0.000000e+00> : vector<128xf32>
    %18 = vector.multi_reduction <add>, %17, %cst_14 [1] : vector<128x128xf32> to vector<128xf32>
    %19 = vector.shape_cast %18 : vector<128xf32> to vector<128x1xf32>
    %c0_15 = arith.constant 0 : index
    %c0_16 = arith.constant 0 : index
    %20 = memref.load %arg7[%c0_15, %c0_16] : memref<1x1xf32, #tpu.memory_space<smem>>
    %21 = vector.broadcast %20 : f32 to vector<128x1xf32>
    %22 = arith.addf %19, %21 : vector<128x1xf32>
    %c0_17 = arith.constant 0 : index
    %c0_18 = arith.constant 0 : index
    %23 = vector.load %arg8[%c0_17, %c0_18] : memref<128x1xf32, #tpu.memory_space<vmem>>, vector<128x1xf32>
    tpu.vector_store %arg8[%c0_17, %c0_18], %22 {strides = array<i32>} : memref<128x1xf32, #tpu.memory_space<vmem>>, vector<128x1xf32>,
    return
  }
  func.func @transform_0(%arg0: i32) -> (i32, i32) {
    %c0_i32 = arith.constant 0 : i32
    %c0_i32_0 = arith.constant 0 : i32
    return %arg0, %c0_i32 : i32, i32
  }
  func.func @transform_1(%arg0: i32) -> (i32, i32) {
    %c0_i32 = arith.constant 0 : i32
    %c0_i32_0 = arith.constant 0 : i32
    %c0_i32_1 = arith.constant 0 : i32
    return %c0_i32, %c0_i32_0 : i32, i32
  }
  func.func @transform_2(%arg0: i32) -> (i32, i32) {
    %c0_i32 = arith.constant 0 : i32
    %c0_i32_0 = arith.constant 0 : i32
    %c0_i32_1 = arith.constant 0 : i32
    return %c0_i32, %c0_i32_0 : i32, i32
  }
  func.func @transform_3(%arg0: i32) -> (i32, i32) {
    %c0_i32 = arith.constant 0 : i32
    %c0_i32_0 = arith.constant 0 : i32
    %c0_i32_1 = arith.constant 0 : i32
    return %c0_i32, %c0_i32_0 : i32, i32
  }
  func.func @transform_4(%arg0: i32) -> (i32, i32) {
    %c0_i32 = arith.constant 0 : i32
    %c0_i32_0 = arith.constant 0 : i32
    %c0_i32_1 = arith.constant 0 : i32
    return %c0_i32, %c0_i32_0 : i32, i32
  }
  func.func @transform_5(%arg0: i32) -> (i32, i32) {
    %c0_i32 = arith.constant 0 : i32
    %c0_i32_0 = arith.constant 0 : i32
    %c0_i32_1 = arith.constant 0 : i32
    return %c0_i32, %c0_i32_0 : i32, i32
  }
  func.func @transform_6(%arg0: i32) -> (i32, i32) {
    %c0_i32 = arith.constant 0 : i32
    %c0_i32_0 = arith.constant 0 : i32
    %c0_i32_1 = arith.constant 0 : i32
    return %c0_i32, %c0_i32_0 : i32, i32
  }
  func.func @transform_7(%arg0: i32) -> (i32, i32) {
    %c0_i32 = arith.constant 0 : i32
    %c0_i32_0 = arith.constant 0 : i32
    return %arg0, %c0_i32 : i32, i32
  }
}

</mosaic_0001>

<bundles_post_ra>
// kernel: tpu_custom_call.1
= control target key start
LH: loop header
LB: loop body
LE: loop exit
PB: predicated region body
PF: predicated region fallthrough
CT: control target
= control target key end

     0   :  { %vm242_vm0 = vcmask 523264   ;;  %vm525_vm1 = vcmask 7168   ;;  %s1053_s1 = inlined_call_operand.vmem [shape: f32[128,64], index: 1, kind: input, shape index: {}]   ;;  %s1054_s0 = inlined_call_operand.vmem [shape: f32[128,128], index: 0, kind: input, shape index: {}]   ;;  %s1055_s3 = inlined_call_operand.vmem [shape: f32[64,128], index: 3, kind: input, shape index: {}]   ;;  %s1056_s2 = inlined_call_operand.vmem [shape: f32[1,64], index: 2, kind: input, shape index: {}]   ;;  %s1057_s4 = inlined_call_operand.vmem [shape: f32[1,128], index: 4, kind: input, shape index: {}]   ;;  %s1058_s5 = inlined_call_operand.vmem [shape: f32[1,128], index: 5, kind: input, shape index: {}]   ;;  %s1059_s6 = inlined_call_operand.<no memory space> [shape: f32[1,1], index: 6, kind: input, shape index: {}]   ;;  %s1060_s7 = inlined_call_operand.vmem [shape: f32[128,1], index: 7, kind: output, shape index: {}]  }
   0x1   :  { %v43_v0 = vld [vmem:[%s1053_s1] sm:$0xff]  ;;  %v44_v1 = vld [vmem:[%s1053_s1 + $0x8] sm:$0xff]  ;;  %v45_v2 = vld [vmem:[%s1053_s1 + $0x10] sm:$0xff] }
   0x2   :  { %v717_v3 = vpack.c.bf16 %v44_v1, %v43_v0  ;;  %v46_v4 = vld [vmem:[%s1053_s1 + $0x18] sm:$0xff]  ;;  %v47_v6 = vld [vmem:[%s1053_s1 + $0x20] sm:$0xff]  ;;  %v48_v7 = vld [vmem:[%s1053_s1 + $0x28] sm:$0xff] }
   0x3   :  { %v721_v5 = vpack.c.bf16 %v46_v4, %v45_v2  ;;  %v725_v8 = vpack.c.bf16 %v48_v7, %v47_v6  ;;  %v27_v9 = vld [vmem:[%s1054_s0] sm:$0xff]  ;;  %v49_v10 = vld [vmem:[%s1053_s1 + $0x30] sm:$0xff]  ;;  %v50_v11 = vld [vmem:[%s1053_s1 + $0x38] sm:$0xff] }
   0x4   :  { %718 = vmatprep.subr.bf16.mxu0 %v717_v3  ;;  %653 = vmatprep.mubr.f32.mxu0 %v27_v9  ;;  %v729_v12 = vpack.c.bf16 %v50_v11, %v49_v10  ;;  %v51_v13 = vld [vmem:[%s1053_s1 + $0x40] sm:$0xff]  ;;  %v52_v14 = vld [vmem:[%s1053_s1 + $0x48] sm:$0xff]  ;;  %v229_v17 = vld [vmem:[%s1055_s3 + $0x10] sm:$0xff] }
   0x5   :  { %720 = vmatpush3.bf16.msra.mxu0 %v717_v3  ;;  %v227_v15 = vld [vmem:[%s1055_s3] sm:$0xff]  ;;  %v228_v16 = vld [vmem:[%s1055_s3 + $0x8] sm:$0xff]  ;;  %v230_v18 = vld [vmem:[%s1055_s3 + $0x18] sm:$0xff]  ;;  %v733_v21 = vpack.c.bf16 %v52_v14, %v51_v13 }
   0x6   :  { %722 = vmatprep.subr.bf16.mxu0 %v721_v5  ;;  %v749_v19 = vpack.c.bf16 %v228_v16, %v227_v15  ;;  %v753_v20 = vpack.c.bf16 %v230_v18, %v229_v17  ;;  %v231_v22 = vld [vmem:[%s1055_s3 + $0x20] sm:$0xff]  ;;  %v232_v23 = vld [vmem:[%s1055_s3 + $0x28] sm:$0xff]  ;;  %v53_v24 = vld [vmem:[%s1053_s1 + $0x50] sm:$0xff] }
   0x7   :  { %v54_v25 = vld [vmem:[%s1053_s1 + $0x58] sm:$0xff]  ;;  %v757_v26 = vpack.c.bf16 %v232_v23, %v231_v22  ;;  %v55_v28 = vld [vmem:[%s1053_s1 + $0x60] sm:$0xff]  ;;  %v56_v29 = vld [vmem:[%s1053_s1 + $0x68] sm:$0xff] }
   0x8   :  { %750 = vmatprep.subr.bf16.mxu1 %v749_v19  ;;  %v737_v27 = vpack.c.bf16 %v54_v25, %v53_v24  ;;  %v741_v30 = vpack.c.bf16 %v56_v29, %v55_v28  ;;  %v57_v31 = vld [vmem:[%s1053_s1 + $0x70] sm:$0xff]  ;;  %v58_v32 = vld [vmem:[%s1053_s1 + $0x78] sm:$0xff]  ;;  %v28_v34 = vld [vmem:[%s1054_s0 + $0x8] sm:$0xff] }
   0x9   :  { %724 = vmatpush3.bf16.msra.mxu0 %v721_v5  ;;  %752 = vmatpush3.bf16.msra.mxu1 %v749_v19  ;;  %v745_v33 = vpack.c.bf16 %v58_v32, %v57_v31  ;;  %v29_v35 = vld [vmem:[%s1054_s0 + $0x10] sm:$0xff]  ;;  %v30_v36 = vld [vmem:[%s1054_s0 + $0x18] sm:$0xff]  ;;  %v31_v37 = vld [vmem:[%s1054_s0 + $0x20] sm:$0xff] }
   0xa   :  { %726 = vmatprep.subr.bf16.mxu0 %v725_v8  ;;  %754 = vmatprep.subr.bf16.mxu1 %v753_v20  ;;  %v32_v38 = vld [vmem:[%s1054_s0 + $0x28] sm:$0xff]  ;;  %v33_v39 = vld [vmem:[%s1054_s0 + $0x30] sm:$0xff]  ;;  %v34_v40 = vld [vmem:[%s1054_s0 + $0x38] sm:$0xff] }
   0xb   :  { %v35_v41 = vld [vmem:[%s1054_s0 + $0x40] sm:$0xff]  ;;  %v36_v42 = vld [vmem:[%s1054_s0 + $0x48] sm:$0xff]  ;;  %v37_v43 = vld [vmem:[%s1054_s0 + $0x50] sm:$0xff] }
   0xc   :  { %v38_v44 = vld [vmem:[%s1054_s0 + $0x58] sm:$0xff]  ;;  %v39_v45 = vld [vmem:[%s1054_s0 + $0x60] sm:$0xff]  ;;  %v40_v46 = vld [vmem:[%s1054_s0 + $0x68] sm:$0xff] }
   0xd   :  { %728 = vmatpush3.bf16.msra.mxu0 %v725_v8  ;;  %756 = vmatpush3.bf16.msra.mxu1 %v753_v20  ;;  %v41_v47 = vld [vmem:[%s1054_s0 + $0x70] sm:$0xff]  ;;  %v42_v48 = vld [vmem:[%s1054_s0 + $0x78] sm:$0xff]  ;;  %v546_v52 = vld [vmem:[%s1056_s2] ss:$0 sm:$0xff] }
   0xe   :  { %730 = vmatprep.subr.bf16.mxu0 %v729_v12  ;;  %758 = vmatprep.subr.bf16.mxu1 %v757_v26  ;;  %v233_v49 = vld [vmem:[%s1055_s3 + $0x30] sm:$0xff]  ;;  %v234_v50 = vld [vmem:[%s1055_s3 + $0x38] sm:$0xff] }
   0xf   :  { %v761_v51 = vpack.c.bf16 %v234_v50, %v233_v49 }
  0x11   :  { %732 = vmatpush3.bf16.msra.mxu0 %v729_v12  ;;  %760 = vmatpush3.bf16.msra.mxu1 %v757_v26 }
  0x12   :  { %734 = vmatprep.subr.bf16.mxu0 %v733_v21  ;;  %762 = vmatprep.subr.bf16.mxu1 %v761_v51 }
  0x15   :  { %736 = vmatpush3.bf16.msra.mxu0 %v733_v21  ;;  %764 = vmatpush3.bf16.msra.mxu1 %v761_v51 }
  0x16   :  { %738 = vmatprep.subr.bf16.mxu0 %v737_v27 }
  0x19   :  { %740 = vmatpush3.bf16.msra.mxu0 %v737_v27 }
  0x1a   :  { %742 = vmatprep.subr.bf16.mxu0 %v741_v30 }
  0x1d   :  { %744 = vmatpush3.bf16.msra.mxu0 %v741_v30 }
  0x1e   :  { %746 = vmatprep.subr.bf16.mxu0 %v745_v33 }
  0x21   :  { %748 = vmatpush3.bf16.msra.mxu0 %v745_v33 }
  0x24   :  { %654 = vmatmul.mubr.f32.vlgmr.msra.gmra.mrb[0].mxu0 %v28_v34 }
  0x25   :  { %656 = vmatprep.mubr.f32.mxu0 %v29_v35 }
  0x28   :  { %657 = vmatmul.mubr.f32.gmra.mrb[2].mxu0 %v30_v36 }
  0x29   :  { %659 = vmatprep.mubr.f32.mxu0 %v31_v37  ;;  %v947_v37 = vld [vmem:[%s1057_s4] ss:$0 sm:$0xff] }
  0x2c   :  { %660 = vmatmul.mubr.f32.gmra.mrb[4].mxu0 %v32_v38 }
  0x2d   :  { %662 = vmatprep.mubr.f32.mxu0 %v33_v39 }
  0x30   :  { %663 = vmatmul.mubr.f32.gmra.mrb[6].mxu0 %v34_v40 }
  0x31   :  { %665 = vmatprep.mubr.f32.mxu0 %v35_v41 }
  0x34   :  { %666 = vmatmul.mubr.f32.gmra.mrb[8].mxu0 %v36_v42  ;;  %v954_v42 = vld [vmem:[%s1058_s5] ss:$0 sm:$0xff] }
  0x35   :  { %668 = vmatprep.mubr.f32.mxu0 %v37_v43 }
  0x38   :  { %669 = vmatmul.mubr.f32.gmra.mrb[10].mxu0 %v38_v44 }
  0x39   :  { %671 = vmatprep.mubr.f32.mxu0 %v39_v45 }
  0x3c   :  { %672 = vmatmul.mubr.f32.gmra.mrb[12].mxu0 %v40_v46 }
  0x3d   :  { %674 = vmatprep.mubr.f32.mxu0 %v41_v47 }
  0x40   :  { %675 = vmatmul.mubr.f32.gmra.mrb[14].mxu0 %v42_v48 }
  0xf7   :  { %v655_v53 = vpop.f32.mrb[0].mxu0 }
  0xf8   :  { %v138_v54 = vadd.f32 %v655_v53, %v546_v52  ;;  %v132_v55 = vpop.f32.mrb[1].mxu0 }
  0xf9   :  { %v133_v56 = vadd.f32 %v546_v52, %v132_v55 }
  0xfa   :  { %v212_v59 = vmax.f32 %v138_v54, 0.0 }
  0xfb   :  { %v211_v57 = vmax.f32 %v133_v56, 0.0  ;;  %v658_v58 = vpop.f32.mrb[2].mxu0 }
  0xfc   :  { %v148_v60 = vadd.f32 %v658_v58, %v546_v52  ;;  %v142_v61 = vpop.f32.mrb[3].mxu0 }
  0xfd   :  { %v143_v62 = vadd.f32 %v546_v52, %v142_v61  ;;  %693 = vmatprep.mubr.msk.f32.mxu1 %vm242_vm0, %v211_v57 }
  0xfe   :  { %694 = vmatmul.mubr.msk.f32.vlgmr.msra.gmra.mrb[0].mxu1 %vm242_vm0, %v212_v59  ;;  %v214_v1 = vmax.f32 %v148_v60, 0.0 }
  0xff   :  { %v213_v63 = vmax.f32 %v143_v62, 0.0  ;;  %v661_v0 = vpop.f32.mrb[4].mxu0 }
 0x100   :  { %v158_v2 = vadd.f32 %v661_v0, %v546_v52  ;;  %v152_v3 = vpop.f32.mrb[5].mxu0 }
 0x101   :  { %v153_v4 = vadd.f32 %v546_v52, %v152_v3  ;;  %696 = vmatprep.mubr.msk.f32.mxu1 %vm242_vm0, %v213_v63 }
 0x102   :  { %v216_v5 = vmax.f32 %v158_v2, 0.0  ;;  %697 = vmatmul.mubr.msk.f32.gmra.mrb[2].mxu1 %vm242_vm0, %v214_v1 }
 0x103   :  { %v215_v6 = vmax.f32 %v153_v4, 0.0  ;;  %v664_v7 = vpop.f32.mrb[6].mxu0 }
 0x104   :  { %v168_v8 = vadd.f32 %v664_v7, %v546_v52  ;;  %v162_v9 = vpop.f32.mrb[7].mxu0 }
 0x105   :  { %v163_v10 = vadd.f32 %v546_v52, %v162_v9  ;;  %699 = vmatprep.mubr.msk.f32.mxu1 %vm242_vm0, %v215_v6 }
 0x106   :  { %v218_v11 = vmax.f32 %v168_v8, 0.0  ;;  %700 = vmatmul.mubr.msk.f32.gmra.mrb[4].mxu1 %vm242_vm0, %v216_v5 }
 0x107   :  { %v217_v12 = vmax.f32 %v163_v10, 0.0  ;;  %v667_v13 = vpop.f32.mrb[8].mxu0 }
 0x108   :  { %v178_v14 = vadd.f32 %v667_v13, %v546_v52  ;;  %v172_v15 = vpop.f32.mrb[9].mxu0 }
 0x109   :  { %v173_v16 = vadd.f32 %v546_v52, %v172_v15  ;;  %702 = vmatprep.mubr.msk.f32.mxu1 %vm242_vm0, %v217_v12 }
 0x10a   :  { %v220_v17 = vmax.f32 %v178_v14, 0.0  ;;  %703 = vmatmul.mubr.msk.f32.gmra.mrb[6].mxu1 %vm242_vm0, %v218_v11 }
 0x10b   :  { %v219_v18 = vmax.f32 %v173_v16, 0.0  ;;  %v670_v19 = vpop.f32.mrb[10].mxu0 }
 0x10c   :  { %v188_v20 = vadd.f32 %v670_v19, %v546_v52  ;;  %v182_v21 = vpop.f32.mrb[11].mxu0 }
 0x10d   :  { %v183_v22 = vadd.f32 %v546_v52, %v182_v21  ;;  %705 = vmatprep.mubr.msk.f32.mxu1 %vm242_vm0, %v219_v18 }
 0x10e   :  { %v222_v23 = vmax.f32 %v188_v20, 0.0  ;;  %706 = vmatmul.mubr.msk.f32.gmra.mrb[8].mxu1 %vm242_vm0, %v220_v17 }
 0x10f   :  { %v221_v24 = vmax.f32 %v183_v22, 0.0  ;;  %v673_v25 = vpop.f32.mrb[12].mxu0 }
 0x110   :  { %v198_v26 = vadd.f32 %v673_v25, %v546_v52  ;;  %v192_v27 = vpop.f32.mrb[13].mxu0 }
 0x111   :  { %v193_v28 = vadd.f32 %v546_v52, %v192_v27  ;;  %708 = vmatprep.mubr.msk.f32.mxu1 %vm242_vm0, %v221_v24 }
 0x112   :  { %v224_v29 = vmax.f32 %v198_v26, 0.0  ;;  %709 = vmatmul.mubr.msk.f32.gmra.mrb[10].mxu1 %vm242_vm0, %v222_v23 }
 0x113   :  { %v223_v30 = vmax.f32 %v193_v28, 0.0  ;;  %v676_v31 = vpop.f32.mrb[14].mxu0 }
 0x114   :  { %v208_v32 = vadd.f32 %v676_v31, %v546_v52  ;;  %v202_v33 = vpop.f32.mrb[15].mxu0 }
 0x115   :  { %v203_v34 = vadd.f32 %v546_v52, %v202_v33  ;;  %711 = vmatprep.mubr.msk.f32.mxu1 %vm242_vm0, %v223_v30 }
 0x116   :  { %v226_v35 = vmax.f32 %v208_v32, 0.0  ;;  %712 = vmatmul.mubr.msk.f32.gmra.mrb[12].mxu1 %vm242_vm0, %v224_v29 }
 0x117   :  { %v225_v36 = vmax.f32 %v203_v34, 0.0 }
 0x119   :  { %714 = vmatprep.mubr.msk.f32.mxu1 %vm242_vm0, %v225_v36 }
 0x11a   :  { %715 = vmatmul.mubr.msk.f32.gmra.mrb[14].mxu1 %vm242_vm0, %v226_v35 }
 0x1d1   :  { %v695_v38 = vpop.f32.mrb[0].mxu1 }
 0x1d2   :  { %v363_v39 = vadd.f32 %v695_v38, %v947_v37  ;;  %v357_v40 = vpop.f32.mrb[1].mxu1 }
 0x1d3   :  { %v358_v41 = vadd.f32 %v947_v37, %v357_v40  ;;  %v508_v40 = vstv %s1059_s6 }
 0x1d4   :  { %v437_v43 = vmax.f32 %v363_v39, 0.0 }
 0x1d5   :  { %v698_v44 = vpop.f32.mrb[2].mxu1  ;;  %v436_v45 = vmax.f32 %v358_v41, 0.0 }
 0x1d6   :  { %v373_v46 = vadd.f32 %v698_v44, %v947_v37  ;;  %v367_v47 = vpop.f32.mrb[3].mxu1  ;;  %v460_v48 = vmul.f32 %v954_v42, %v437_v43 }
 0x1d7   :  { %v368_v49 = vadd.f32 %v947_v37, %v367_v47  ;;  %v459_v56 = vmul.f32 %v954_v42, %v436_v45 }
 0x1d8   :  { %v439_v50 = vmax.f32 %v373_v46, 0.0  ;;  %477 = vadd.xlane.f32.xlu0 %v460_v48 }
 0x1d9   :  { %v701_v51 = vpop.f32.mrb[4].mxu1  ;;  %v438_v52 = vmax.f32 %v368_v49, 0.0 }
 0x1da   :  { %v383_v53 = vadd.f32 %v701_v51, %v947_v37  ;;  %v377_v54 = vpop.f32.mrb[5].mxu1  ;;  %v462_v55 = vmul.f32 %v954_v42, %v439_v50 }
 0x1db   :  { %v378_v57 = vadd.f32 %v947_v37, %v377_v54  ;;  %v461_v63 = vmul.f32 %v954_v42, %v438_v52 }
 0x1dc   :  { %481 = vadd.xlane.f32.xlu1 %v462_v55  ;;  %475 = vadd.xlane.f32.xlu0 %v459_v56  ;;  %v441_v60 = vmax.f32 %v383_v53, 0.0 }
 0x1dd   :  { %v440_v58 = vmax.f32 %v378_v57, 0.0  ;;  %v704_v59 = vpop.f32.mrb[6].mxu1 }
 0x1de   :  { %v393_v61 = vadd.f32 %v704_v59, %v947_v37  ;;  %v387_v62 = vpop.f32.mrb[7].mxu1  ;;  %v464_v7 = vmul.f32 %v954_v42, %v441_v60 }
 0x1df   :  { %v388_v0 = vadd.f32 %v947_v37, %v387_v62  ;;  %v463_v1 = vmul.f32 %v954_v42, %v440_v58 }
 0x1e0   :  { %479 = vadd.xlane.f32.xlu1 %v461_v63  ;;  %v443_v4 = vmax.f32 %v393_v61, 0.0 }
 0x1e1   :  { %v442_v2 = vmax.f32 %v388_v0, 0.0  ;;  %v707_v3 = vpop.f32.mrb[8].mxu1  ;;  %483 = vadd.xlane.f32.xlu0 %v463_v1 }
 0x1e2   :  { %v403_v5 = vadd.f32 %v707_v3, %v947_v37  ;;  %v397_v6 = vpop.f32.mrb[9].mxu1  ;;  %v466_v15 = vmul.f32 %v954_v42, %v443_v4 }
 0x1e3   :  { %v398_v8 = vadd.f32 %v947_v37, %v397_v6  ;;  %v465_v9 = vmul.f32 %v954_v42, %v442_v2 }
 0x1e4   :  { %485 = vadd.xlane.f32.xlu1 %v464_v7  ;;  %v445_v12 = vmax.f32 %v403_v5, 0.0 }
 0x1e5   :  { %v444_v10 = vmax.f32 %v398_v8, 0.0  ;;  %v710_v11 = vpop.f32.mrb[10].mxu1  ;;  %487 = vadd.xlane.f32.xlu0 %v465_v9 }
 0x1e6   :  { %v413_v13 = vadd.f32 %v710_v11, %v947_v37  ;;  %v407_v14 = vpop.f32.mrb[11].mxu1  ;;  %v468_v23 = vmul.f32 %v954_v42, %v445_v12 }
 0x1e7   :  { %v408_v16 = vadd.f32 %v947_v37, %v407_v14  ;;  %v467_v17 = vmul.f32 %v954_v42, %v444_v10 }
 0x1e8   :  { %489 = vadd.xlane.f32.xlu1 %v466_v15  ;;  %v447_v20 = vmax.f32 %v413_v13, 0.0 }
 0x1e9   :  { %v446_v18 = vmax.f32 %v408_v16, 0.0  ;;  %v713_v19 = vpop.f32.mrb[12].mxu1  ;;  %491 = vadd.xlane.f32.xlu0 %v467_v17 }
 0x1ea   :  { %v423_v21 = vadd.f32 %v713_v19, %v947_v37  ;;  %v417_v22 = vpop.f32.mrb[13].mxu1  ;;  %v470_v31 = vmul.f32 %v954_v42, %v447_v20 }
 0x1eb   :  { %v418_v24 = vadd.f32 %v947_v37, %v417_v22  ;;  %v469_v25 = vmul.f32 %v954_v42, %v446_v18 }
 0x1ec   :  { %493 = vadd.xlane.f32.xlu1 %v468_v23  ;;  %v449_v28 = vmax.f32 %v423_v21, 0.0 }
 0x1ed   :  { %v448_v26 = vmax.f32 %v418_v24, 0.0  ;;  %v716_v27 = vpop.f32.mrb[14].mxu1  ;;  %495 = vadd.xlane.f32.xlu0 %v469_v25 }
 0x1ee   :  { %v433_v29 = vadd.f32 %v716_v27, %v947_v37  ;;  %v427_v30 = vpop.f32.mrb[15].mxu1  ;;  %v472_v36 = vmul.f32 %v954_v42, %v449_v28 }
 0x1ef   :  { %v428_v32 = vadd.f32 %v947_v37, %v427_v30  ;;  %v471_v33 = vmul.f32 %v954_v42, %v448_v26 }
 0x1f0   :  { %497 = vadd.xlane.f32.xlu1 %v470_v31  ;;  %v451_v35 = vmax.f32 %v433_v29, 0.0 }
 0x1f1   :  { %v450_v34 = vmax.f32 %v428_v32, 0.0  ;;  %499 = vadd.xlane.f32.xlu0 %v471_v33 }
 0x1f2   :  { %v474_v39 = vmul.f32 %v954_v42, %v451_v35 }
 0x1f3   :  { %v473_v38 = vmul.f32 %v954_v42, %v450_v34 }
 0x1f4   :  { %501 = vadd.xlane.f32.xlu1 %v472_v36 }
 0x1f5   :  { %503 = vadd.xlane.f32.xlu0 %v473_v38 }
 0x1f8   :  { %505 = vadd.xlane.f32.xlu1 %v474_v39 }
 0x265   :  { %v478_v37 = vpop.xlane.xlu0 %477 }
 0x266   :  { %v510_v41 = vadd.f32 %v508_v40, %v478_v37 }
 0x268   :  { %527 = vst.msk [vmem:[%s1060_s7 + $0x8] sm:$0xff] %vm525_vm1, %v510_v41 }
 0x269   :  { %v482_v43 = vpop.xlane.xlu1 %481  ;;  %v476_v44 = vpop.xlane.xlu0 %475 }
 0x26a   :  { %v512_v45 = vadd.f32 %v508_v40, %v482_v43  ;;  %v509_v46 = vadd.f32 %v508_v40, %v476_v44 }
 0x26c   :  { %529 = vst.msk [vmem:[%s1060_s7 + $0x18] sm:$0xff] %vm525_vm1, %v512_v45  ;;  %526 = vst.msk [vmem:[%s1060_s7] sm:$0xff] %vm525_vm1, %v509_v46 }
 0x26d   :  { %v480_v42 = vpop.xlane.xlu1 %479 }
 0x26e   :  { %v511_v47 = vadd.f32 %v508_v40, %v480_v42  ;;  %v484_v48 = vpop.xlane.xlu0 %483 }
 0x26f   :  { %v513_v49 = vadd.f32 %v508_v40, %v484_v48 }
 0x270   :  { %528 = vst.msk [vmem:[%s1060_s7 + $0x10] sm:$0xff] %vm525_vm1, %v511_v47 }
 0x271   :  { %530 = vst.msk [vmem:[%s1060_s7 + $0x20] sm:$0xff] %vm525_vm1, %v513_v49  ;;  %v486_v50 = vpop.xlane.xlu1 %485 }
 0x272   :  { %v514_v51 = vadd.f32 %v508_v40, %v486_v50  ;;  %v488_v52 = vpop.xlane.xlu0 %487 }
 0x273   :  { %v515_v53 = vadd.f32 %v508_v40, %v488_v52 }
 0x274   :  { %531 = vst.msk [vmem:[%s1060_s7 + $0x28] sm:$0xff] %vm525_vm1, %v514_v51 }
 0x275   :  { %532 = vst.msk [vmem:[%s1060_s7 + $0x30] sm:$0xff] %vm525_vm1, %v515_v53  ;;  %v490_v54 = vpop.xlane.xlu1 %489 }
 0x276   :  { %v516_v55 = vadd.f32 %v508_v40, %v490_v54  ;;  %v492_v56 = vpop.xlane.xlu0 %491 }
 0x277   :  { %v517_v57 = vadd.f32 %v508_v40, %v492_v56 }
 0x278   :  { %533 = vst.msk [vmem:[%s1060_s7 + $0x38] sm:$0xff] %vm525_vm1, %v516_v55 }
 0x279   :  { %534 = vst.msk [vmem:[%s1060_s7 + $0x40] sm:$0xff] %vm525_vm1, %v517_v57  ;;  %v494_v58 = vpop.xlane.xlu1 %493 }
 0x27a   :  { %v518_v59 = vadd.f32 %v508_v40, %v494_v58  ;;  %v496_v60 = vpop.xlane.xlu0 %495 }
 0x27b   :  { %v519_v61 = vadd.f32 %v508_v40, %v496_v60 }
 0x27c   :  { %535 = vst.msk [vmem:[%s1060_s7 + $0x48] sm:$0xff] %vm525_vm1, %v518_v59 }
 0x27d   :  { %536 = vst.msk [vmem:[%s1060_s7 + $0x50] sm:$0xff] %vm525_vm1, %v519_v61  ;;  %v498_v62 = vpop.xlane.xlu1 %497 }
 0x27e   :  { %v520_v63 = vadd.f32 %v508_v40, %v498_v62  ;;  %v500_v0 = vpop.xlane.xlu0 %499 }
 0x27f   :  { %v521_v1 = vadd.f32 %v508_v40, %v500_v0 }
 0x280   :  { %537 = vst.msk [vmem:[%s1060_s7 + $0x58] sm:$0xff] %vm525_vm1, %v520_v63 }
 0x281   :  { %538 = vst.msk [vmem:[%s1060_s7 + $0x60] sm:$0xff] %vm525_vm1, %v521_v1  ;;  %v502_v2 = vpop.xlane.xlu1 %501 }
 0x282   :  { %v522_v3 = vadd.f32 %v508_v40, %v502_v2  ;;  %v504_v4 = vpop.xlane.xlu0 %503 }
 0x283   :  { %v523_v5 = vadd.f32 %v508_v40, %v504_v4 }
 0x284   :  { %539 = vst.msk [vmem:[%s1060_s7 + $0x68] sm:$0xff] %vm525_vm1, %v522_v3 }
 0x285   :  { %540 = vst.msk [vmem:[%s1060_s7 + $0x70] sm:$0xff] %vm525_vm1, %v523_v5  ;;  %v506_v6 = vpop.xlane.xlu1 %505 }
 0x286   :  { %v524_v7 = vadd.f32 %v508_v40, %v506_v6 }
 0x288   :  { %541 = vst.msk [vmem:[%s1060_s7 + $0x78] sm:$0xff] %vm525_vm1, %v524_v7 }

// kernel: tpu_custom_call.1
= control target key start
LH: loop header
LB: loop body
LE: loop exit
PB: predicated region body
PF: predicated region fallthrough
CT: control target
= control target key end

     0   :  { %vm242_vm0 = vcmask 523264   ;;  %vm525_vm1 = vcmask 7168   ;;  %s1053_s1 = inlined_call_operand.vmem [shape: f32[128,64], index: 1, kind: input, shape index: {}]   ;;  %s1054_s0 = inlined_call_operand.vmem [shape: f32[128,128], index: 0, kind: input, shape index: {}]   ;;  %s1055_s3 = inlined_call_operand.vmem [shape: f32[64,128], index: 3, kind: input, shape index: {}]   ;;  %s1056_s2 = inlined_call_operand.vmem [shape: f32[1,64], index: 2, kind: input, shape index: {}]   ;;  %s1057_s4 = inlined_call_operand.vmem [shape: f32[1,128], index: 4, kind: input, shape index: {}]   ;;  %s1058_s5 = inlined_call_operand.vmem [shape: f32[1,128], index: 5, kind: input, shape index: {}]   ;;  %s1059_s6 = inlined_call_operand.<no memory space> [shape: f32[1,1], index: 6, kind: input, shape index: {}]   ;;  %s1060_s7 = inlined_call_operand.vmem [shape: f32[128,1], index: 7, kind: output, shape index: {}]  }
   0x1   :  { %v43_v0 = vld [vmem:[%s1053_s1] sm:$0xff]  ;;  %v44_v1 = vld [vmem:[%s1053_s1 + $0x8] sm:$0xff]  ;;  %v45_v2 = vld [vmem:[%s1053_s1 + $0x10] sm:$0xff] }
   0x2   :  { %v717_v3 = vpack.c.bf16 %v44_v1, %v43_v0  ;;  %v46_v4 = vld [vmem:[%s1053_s1 + $0x18] sm:$0xff]  ;;  %v47_v6 = vld [vmem:[%s1053_s1 + $0x20] sm:$0xff]  ;;  %v48_v7 = vld [vmem:[%s1053_s1 + $0x28] sm:$0xff] }
   0x3   :  { %v721_v5 = vpack.c.bf16 %v46_v4, %v45_v2  ;;  %v725_v8 = vpack.c.bf16 %v48_v7, %v47_v6  ;;  %v27_v9 = vld [vmem:[%s1054_s0] sm:$0xff]  ;;  %v49_v10 = vld [vmem:[%s1053_s1 + $0x30] sm:$0xff]  ;;  %v50_v11 = vld [vmem:[%s1053_s1 + $0x38] sm:$0xff] }
   0x4   :  { %718 = vmatprep.subr.bf16.mxu0 %v717_v3  ;;  %653 = vmatprep.mubr.f32.mxu0 %v27_v9  ;;  %v729_v12 = vpack.c.bf16 %v50_v11, %v49_v10  ;;  %v51_v13 = vld [vmem:[%s1053_s1 + $0x40] sm:$0xff]  ;;  %v52_v14 = vld [vmem:[%s1053_s1 + $0x48] sm:$0xff]  ;;  %v229_v17 = vld [vmem:[%s1055_s3 + $0x10] sm:$0xff] }
   0x5   :  { %720 = vmatpush3.bf16.msra.mxu0 %v717_v3  ;;  %v227_v15 = vld [vmem:[%s1055_s3] sm:$0xff]  ;;  %v228_v16 = vld [vmem:[%s1055_s3 + $0x8] sm:$0xff]  ;;  %v230_v18 = vld [vmem:[%s1055_s3 + $0x18] sm:$0xff]  ;;  %v733_v21 = vpack.c.bf16 %v52_v14, %v51_v13 }
   0x6   :  { %722 = vmatprep.subr.bf16.mxu0 %v721_v5  ;;  %v749_v19 = vpack.c.bf16 %v228_v16, %v227_v15  ;;  %v753_v20 = vpack.c.bf16 %v230_v18, %v229_v17  ;;  %v231_v22 = vld [vmem:[%s1055_s3 + $0x20] sm:$0xff]  ;;  %v232_v23 = vld [vmem:[%s1055_s3 + $0x28] sm:$0xff]  ;;  %v53_v24 = vld [vmem:[%s1053_s1 + $0x50] sm:$0xff] }
   0x7   :  { %v54_v25 = vld [vmem:[%s1053_s1 + $0x58] sm:$0xff]  ;;  %v757_v26 = vpack.c.bf16 %v232_v23, %v231_v22  ;;  %v55_v28 = vld [vmem:[%s1053_s1 + $0x60] sm:$0xff]  ;;  %v56_v29 = vld [vmem:[%s1053_s1 + $0x68] sm:$0xff] }
   0x8   :  { %750 = vmatprep.subr.bf16.mxu1 %v749_v19  ;;  %v737_v27 = vpack.c.bf16 %v54_v25, %v53_v24  ;;  %v741_v30 = vpack.c.bf16 %v56_v29, %v55_v28  ;;  %v57_v31 = vld [vmem:[%s1053_s1 + $0x70] sm:$0xff]  ;;  %v58_v32 = vld [vmem:[%s1053_s1 + $0x78] sm:$0xff]  ;;  %v28_v34 = vld [vmem:[%s1054_s0 + $0x8] sm:$0xff] }
   0x9   :  { %724 = vmatpush3.bf16.msra.mxu0 %v721_v5  ;;  %752 = vmatpush3.bf16.msra.mxu1 %v749_v19  ;;  %v745_v33 = vpack.c.bf16 %v58_v32, %v57_v31  ;;  %v29_v35 = vld [vmem:[%s1054_s0 + $0x10] sm:$0xff]  ;;  %v30_v36 = vld [vmem:[%s1054_s0 + $0x18] sm:$0xff]  ;;  %v31_v37 = vld [vmem:[%s1054_s0 + $0x20] sm:$0xff] }
   0xa   :  { %726 = vmatprep.subr.bf16.mxu0 %v725_v8  ;;  %754 = vmatprep.subr.bf16.mxu1 %v753_v20  ;;  %v32_v38 = vld [vmem:[%s1054_s0 + $0x28] sm:$0xff]  ;;  %v33_v39 = vld [vmem:[%s1054_s0 + $0x30] sm:$0xff]  ;;  %v34_v40 = vld [vmem:[%s1054_s0 + $0x38] sm:$0xff] }
   0xb   :  { %v35_v41 = vld [vmem:[%s1054_s0 + $0x40] sm:$0xff]  ;;  %v36_v42 = vld [vmem:[%s1054_s0 + $0x48] sm:$0xff]  ;;  %v37_v43 = vld [vmem:[%s1054_s0 + $0x50] sm:$0xff] }
   0xc   :  { %v38_v44 = vld [vmem:[%s1054_s0 + $0x58] sm:$0xff]  ;;  %v39_v45 = vld [vmem:[%s1054_s0 + $0x60] sm:$0xff]  ;;  %v40_v46 = vld [vmem:[%s1054_s0 + $0x68] sm:$0xff] }
   0xd   :  { %728 = vmatpush3.bf16.msra.mxu0 %v725_v8  ;;  %756 = vmatpush3.bf16.msra.mxu1 %v753_v20  ;;  %v41_v47 = vld [vmem:[%s1054_s0 + $0x70] sm:$0xff]  ;;  %v42_v48 = vld [vmem:[%s1054_s0 + $0x78] sm:$0xff]  ;;  %v546_v52 = vld [vmem:[%s1056_s2] ss:$0 sm:$0xff] }
   0xe   :  { %730 = vmatprep.subr.bf16.mxu0 %v729_v12  ;;  %758 = vmatprep.subr.bf16.mxu1 %v757_v26  ;;  %v233_v49 = vld [vmem:[%s1055_s3 + $0x30] sm:$0xff]  ;;  %v234_v50 = vld [vmem:[%s1055_s3 + $0x38] sm:$0xff] }
   0xf   :  { %v761_v51 = vpack.c.bf16 %v234_v50, %v233_v49 }
  0x11   :  { %732 = vmatpush3.bf16.msra.mxu0 %v729_v12  ;;  %760 = vmatpush3.bf16.msra.mxu1 %v757_v26 }
  0x12   :  { %734 = vmatprep.subr.bf16.mxu0 %v733_v21  ;;  %762 = vmatprep.subr.bf16.mxu1 %v761_v51 }
  0x15   :  { %736 = vmatpush3.bf16.msra.mxu0 %v733_v21  ;;  %764 = vmatpush3.bf16.msra.mxu1 %v761_v51 }
  0x16   :  { %738 = vmatprep.subr.bf16.mxu0 %v737_v27 }
  0x19   :  { %740 = vmatpush3.bf16.msra.mxu0 %v737_v27 }
  0x1a   :  { %742 = vmatprep.subr.bf16.mxu0 %v741_v30 }
  0x1d   :  { %744 = vmatpush3.bf16.msra.mxu0 %v741_v30 }
  0x1e   :  { %746 = vmatprep.subr.bf16.mxu0 %v745_v33 }
  0x21   :  { %748 = vmatpush3.bf16.msra.mxu0 %v745_v33 }
  0x24   :  { %654 = vmatmul.mubr.f32.vlgmr.msra.gmra.mrb[0].mxu0 %v28_v34 }
  0x25   :  { %656 = vmatprep.mubr.f32.mxu0 %v29_v35 }
  0x28   :  { %657 = vmatmul.mubr.f32.gmra.mrb[2].mxu0 %v30_v36 }
  0x29   :  { %659 = vmatprep.mubr.f32.mxu0 %v31_v37  ;;  %v947_v37 = vld [vmem:[%s1057_s4] ss:$0 sm:$0xff] }
  0x2c   :  { %660 = vmatmul.mubr.f32.gmra.mrb[4].mxu0 %v32_v38 }
  0x2d   :  { %662 = vmatprep.mubr.f32.mxu0 %v33_v39 }
  0x30   :  { %663 = vmatmul.mubr.f32.gmra.mrb[6].mxu0 %v34_v40 }
  0x31   :  { %665 = vmatprep.mubr.f32.mxu0 %v35_v41 }
  0x34   :  { %666 = vmatmul.mubr.f32.gmra.mrb[8].mxu0 %v36_v42  ;;  %v954_v42 = vld [vmem:[%s1058_s5] ss:$0 sm:$0xff] }
  0x35   :  { %668 = vmatprep.mubr.f32.mxu0 %v37_v43 }
  0x38   :  { %669 = vmatmul.mubr.f32.gmra.mrb[10].mxu0 %v38_v44 }
  0x39   :  { %671 = vmatprep.mubr.f32.mxu0 %v39_v45 }
  0x3c   :  { %672 = vmatmul.mubr.f32.gmra.mrb[12].mxu0 %v40_v46 }
  0x3d   :  { %674 = vmatprep.mubr.f32.mxu0 %v41_v47 }
  0x40   :  { %675 = vmatmul.mubr.f32.gmra.mrb[14].mxu0 %v42_v48 }
  0xf7   :  { %v655_v53 = vpop.f32.mrb[0].mxu0 }
  0xf8   :  { %v138_v54 = vadd.f32 %v655_v53, %v546_v52  ;;  %v132_v55 = vpop.f32.mrb[1].mxu0 }
  0xf9   :  { %v133_v56 = vadd.f32 %v546_v52, %v132_v55 }
  0xfa   :  { %v212_v59 = vmax.f32 %v138_v54, 0.0 }
  0xfb   :  { %v211_v57 = vmax.f32 %v133_v56, 0.0  ;;  %v658_v58 = vpop.f32.mrb[2].mxu0 }
  0xfc   :  { %v148_v60 = vadd.f32 %v658_v58, %v546_v52  ;;  %v142_v61 = vpop.f32.mrb[3].mxu0 }
  0xfd   :  { %v143_v62 = vadd.f32 %v546_v52, %v142_v61  ;;  %693 = vmatprep.mubr.msk.f32.mxu1 %vm242_vm0, %v211_v57 }
  0xfe   :  { %694 = vmatmul.mubr.msk.f32.vlgmr.msra.gmra.mrb[0].mxu1 %vm242_vm0, %v212_v59  ;;  %v214_v1 = vmax.f32 %v148_v60, 0.0 }
  0xff   :  { %v213_v63 = vmax.f32 %v143_v62, 0.0  ;;  %v661_v0 = vpop.f32.mrb[4].mxu0 }
 0x100   :  { %v158_v2 = vadd.f32 %v661_v0, %v546_v52  ;;  %v152_v3 = vpop.f32.mrb[5].mxu0 }
 0x101   :  { %v153_v4 = vadd.f32 %v546_v52, %v152_v3  ;;  %696 = vmatprep.mubr.msk.f32.mxu1 %vm242_vm0, %v213_v63 }
 0x102   :  { %v216_v5 = vmax.f32 %v158_v2, 0.0  ;;  %697 = vmatmul.mubr.msk.f32.gmra.mrb[2].mxu1 %vm242_vm0, %v214_v1 }
 0x103   :  { %v215_v6 = vmax.f32 %v153_v4, 0.0  ;;  %v664_v7 = vpop.f32.mrb[6].mxu0 }
 0x104   :  { %v168_v8 = vadd.f32 %v664_v7, %v546_v52  ;;  %v162_v9 = vpop.f32.mrb[7].mxu0 }
 0x105   :  { %v163_v10 = vadd.f32 %v546_v52, %v162_v9  ;;  %699 = vmatprep.mubr.msk.f32.mxu1 %vm242_vm0, %v215_v6 }
 0x106   :  { %v218_v11 = vmax.f32 %v168_v8, 0.0  ;;  %700 = vmatmul.mubr.msk.f32.gmra.mrb[4].mxu1 %vm242_vm0, %v216_v5 }
 0x107   :  { %v217_v12 = vmax.f32 %v163_v10, 0.0  ;;  %v667_v13 = vpop.f32.mrb[8].mxu0 }
 0x108   :  { %v178_v14 = vadd.f32 %v667_v13, %v546_v52  ;;  %v172_v15 = vpop.f32.mrb[9].mxu0 }
 0x109   :  { %v173_v16 = vadd.f32 %v546_v52, %v172_v15  ;;  %702 = vmatprep.mubr.msk.f32.mxu1 %vm242_vm0, %v217_v12 }
 0x10a   :  { %v220_v17 = vmax.f32 %v178_v14, 0.0  ;;  %703 = vmatmul.mubr.msk.f32.gmra.mrb[6].mxu1 %vm242_vm0, %v218_v11 }
 0x10b   :  { %v219_v18 = vmax.f32 %v173_v16, 0.0  ;;  %v670_v19 = vpop.f32.mrb[10].mxu0 }
 0x10c   :  { %v188_v20 = vadd.f32 %v670_v19, %v546_v52  ;;  %v182_v21 = vpop.f32.mrb[11].mxu0 }
 0x10d   :  { %v183_v22 = vadd.f32 %v546_v52, %v182_v21  ;;  %705 = vmatprep.mubr.msk.f32.mxu1 %vm242_vm0, %v219_v18 }
 0x10e   :  { %v222_v23 = vmax.f32 %v188_v20, 0.0  ;;  %706 = vmatmul.mubr.msk.f32.gmra.mrb[8].mxu1 %vm242_vm0, %v220_v17 }
 0x10f   :  { %v221_v24 = vmax.f32 %v183_v22, 0.0  ;;  %v673_v25 = vpop.f32.mrb[12].mxu0 }
 0x110   :  { %v198_v26 = vadd.f32 %v673_v25, %v546_v52  ;;  %v192_v27 = vpop.f32.mrb[13].mxu0 }
 0x111   :  { %v193_v28 = vadd.f32 %v546_v52, %v192_v27  ;;  %708 = vmatprep.mubr.msk.f32.mxu1 %vm242_vm0, %v221_v24 }
 0x112   :  { %v224_v29 = vmax.f32 %v198_v26, 0.0  ;;  %709 = vmatmul.mubr.msk.f32.gmra.mrb[10].mxu1 %vm242_vm0, %v222_v23 }
 0x113   :  { %v223_v30 = vmax.f32 %v193_v28, 0.0  ;;  %v676_v31 = vpop.f32.mrb[14].mxu0 }
 0x114   :  { %v208_v32 = vadd.f32 %v676_v31, %v546_v52  ;;  %v202_v33 = vpop.f32.mrb[15].mxu0 }
 0x115   :  { %v203_v34 = vadd.f32 %v546_v52, %v202_v33  ;;  %711 = vmatprep.mubr.msk.f32.mxu1 %vm242_vm0, %v223_v30 }
 0x116   :  { %v226_v35 = vmax.f32 %v208_v32, 0.0  ;;  %712 = vmatmul.mubr.msk.f32.gmra.mrb[12].mxu1 %vm242_vm0, %v224_v29 }
 0x117   :  { %v225_v36 = vmax.f32 %v203_v34, 0.0 }
 0x119   :  { %714 = vmatprep.mubr.msk.f32.mxu1 %vm242_vm0, %v225_v36 }
 0x11a   :  { %715 = vmatmul.mubr.msk.f32.gmra.mrb[14].mxu1 %vm242_vm0, %v226_v35 }
 0x1d1   :  { %v695_v38 = vpop.f32.mrb[0].mxu1 }
 0x1d2   :  { %v363_v39 = vadd.f32 %v695_v38, %v947_v37  ;;  %v357_v40 = vpop.f32.mrb[1].mxu1 }
 0x1d3   :  { %v358_v41 = vadd.f32 %v947_v37, %v357_v40  ;;  %v508_v40 = vstv %s1059_s6 }
 0x1d4   :  { %v437_v43 = vmax.f32 %v363_v39, 0.0 }
 0x1d5   :  { %v698_v44 = vpop.f32.mrb[2].mxu1  ;;  %v436_v45 = vmax.f32 %v358_v41, 0.0 }
 0x1d6   :  { %v373_v46 = vadd.f32 %v698_v44, %v947_v37  ;;  %v367_v47 = vpop.f32.mrb[3].mxu1  ;;  %v460_v48 = vmul.f32 %v954_v42, %v437_v43 }
 0x1d7   :  { %v368_v49 = vadd.f32 %v947_v37, %v367_v47  ;;  %v459_v56 = vmul.f32 %v954_v42, %v436_v45 }
 0x1d8   :  { %v439_v50 = vmax.f32 %v373_v46, 0.0  ;;  %477 = vadd.xlane.f32.xlu0 %v460_v48 }
 0x1d9   :  { %v701_v51 = vpop.f32.mrb[4].mxu1  ;;  %v438_v52 = vmax.f32 %v368_v49, 0.0 }
 0x1da   :  { %v383_v53 = vadd.f32 %v701_v51, %v947_v37  ;;  %v377_v54 = vpop.f32.mrb[5].mxu1  ;;  %v462_v55 = vmul.f32 %v954_v42, %v439_v50 }
 0x1db   :  { %v378_v57 = vadd.f32 %v947_v37, %v377_v54  ;;  %v461_v63 = vmul.f32 %v954_v42, %v438_v52 }
 0x1dc   :  { %481 = vadd.xlane.f32.xlu1 %v462_v55  ;;  %475 = vadd.xlane.f32.xlu0 %v459_v56  ;;  %v441_v60 = vmax.f32 %v383_v53, 0.0 }
 0x1dd   :  { %v440_v58 = vmax.f32 %v378_v57, 0.0  ;;  %v704_v59 = vpop.f32.mrb[6].mxu1 }
 0x1de   :  { %v393_v61 = vadd.f32 %v704_v59, %v947_v37  ;;  %v387_v62 = vpop.f32.mrb[7].mxu1  ;;  %v464_v7 = vmul.f32 %v954_v42, %v441_v60 }
 0x1df   :  { %v388_v0 = vadd.f32 %v947_v37, %v387_v62  ;;  %v463_v1 = vmul.f32 %v954_v42, %v440_v58 }
 0x1e0   :  { %479 = vadd.xlane.f32.xlu1 %v461_v63  ;;  %v443_v4 = vmax.f32 %v393_v61, 0.0 }
 0x1e1   :  { %v442_v2 = vmax.f32 %v388_v0, 0.0  ;;  %v707_v3 = vpop.f32.mrb[8].mxu1  ;;  %483 = vadd.xlane.f32.xlu0 %v463_v1 }
 0x1e2   :  { %v403_v5 = vadd.f32 %v707_v3, %v947_v37  ;;  %v397_v6 = vpop.f32.mrb[9].mxu1  ;;  %v466_v15 = vmul.f32 %v954_v42, %v443_v4 }
 0x1e3   :  { %v398_v8 = vadd.f32 %v947_v37, %v397_v6  ;;  %v465_v9 = vmul.f32 %v954_v42, %v442_v2 }
 0x1e4   :  { %485 = vadd.xlane.f32.xlu1 %v464_v7  ;;  %v445_v12 = vmax.f32 %v403_v5, 0.0 }
 0x1e5   :  { %v444_v10 = vmax.f32 %v398_v8, 0.0  ;;  %v710_v11 = vpop.f32.mrb[10].mxu1  ;;  %487 = vadd.xlane.f32.xlu0 %v465_v9 }
 0x1e6   :  { %v413_v13 = vadd.f32 %v710_v11, %v947_v37  ;;  %v407_v14 = vpop.f32.mrb[11].mxu1  ;;  %v468_v23 = vmul.f32 %v954_v42, %v445_v12 }
 0x1e7   :  { %v408_v16 = vadd.f32 %v947_v37, %v407_v14  ;;  %v467_v17 = vmul.f32 %v954_v42, %v444_v10 }
 0x1e8   :  { %489 = vadd.xlane.f32.xlu1 %v466_v15  ;;  %v447_v20 = vmax.f32 %v413_v13, 0.0 }
 0x1e9   :  { %v446_v18 = vmax.f32 %v408_v16, 0.0  ;;  %v713_v19 = vpop.f32.mrb[12].mxu1  ;;  %491 = vadd.xlane.f32.xlu0 %v467_v17 }
 0x1ea   :  { %v423_v21 = vadd.f32 %v713_v19, %v947_v37  ;;  %v417_v22 = vpop.f32.mrb[13].mxu1  ;;  %v470_v31 = vmul.f32 %v954_v42, %v447_v20 }
 0x1eb   :  { %v418_v24 = vadd.f32 %v947_v37, %v417_v22  ;;  %v469_v25 = vmul.f32 %v954_v42, %v446_v18 }
 0x1ec   :  { %493 = vadd.xlane.f32.xlu1 %v468_v23  ;;  %v449_v28 = vmax.f32 %v423_v21, 0.0 }
 0x1ed   :  { %v448_v26 = vmax.f32 %v418_v24, 0.0  ;;  %v716_v27 = vpop.f32.mrb[14].mxu1  ;;  %495 = vadd.xlane.f32.xlu0 %v469_v25 }
 0x1ee   :  { %v433_v29 = vadd.f32 %v716_v27, %v947_v37  ;;  %v427_v30 = vpop.f32.mrb[15].mxu1  ;;  %v472_v36 = vmul.f32 %v954_v42, %v449_v28 }
 0x1ef   :  { %v428_v32 = vadd.f32 %v947_v37, %v427_v30  ;;  %v471_v33 = vmul.f32 %v954_v42, %v448_v26 }
 0x1f0   :  { %497 = vadd.xlane.f32.xlu1 %v470_v31  ;;  %v451_v35 = vmax.f32 %v433_v29, 0.0 }
 0x1f1   :  { %v450_v34 = vmax.f32 %v428_v32, 0.0  ;;  %499 = vadd.xlane.f32.xlu0 %v471_v33 }
 0x1f2   :  { %v474_v39 = vmul.f32 %v954_v42, %v451_v35 }
 0x1f3   :  { %v473_v38 = vmul.f32 %v954_v42, %v450_v34 }
 0x1f4   :  { %501 = vadd.xlane.f32.xlu1 %v472_v36 }
 0x1f5   :  { %503 = vadd.xlane.f32.xlu0 %v473_v38 }
 0x1f8   :  { %505 = vadd.xlane.f32.xlu1 %v474_v39 }
 0x265   :  { %v478_v37 = vpop.xlane.xlu0 %477 }
 0x266   :  { %v510_v41 = vadd.f32 %v508_v40, %v478_v37 }
 0x268   :  { %527 = vst.msk [vmem:[%s1060_s7 + $0x8] sm:$0xff] %vm525_vm1, %v510_v41 }
 0x269   :  { %v482_v43 = vpop.xlane.xlu1 %481  ;;  %v476_v44 = vpop.xlane.xlu0 %475 }
 0x26a   :  { %v512_v45 = vadd.f32 %v508_v40, %v482_v43  ;;  %v509_v46 = vadd.f32 %v508_v40, %v476_v44 }
 0x26c   :  { %529 = vst.msk [vmem:[%s1060_s7 + $0x18] sm:$0xff] %vm525_vm1, %v512_v45  ;;  %526 = vst.msk [vmem:[%s1060_s7] sm:$0xff] %vm525_vm1, %v509_v46 }
 0x26d   :  { %v480_v42 = vpop.xlane.xlu1 %479 }
 0x26e   :  { %v511_v47 = vadd.f32 %v508_v40, %v480_v42  ;;  %v484_v48 = vpop.xlane.xlu0 %483 }
 0x26f   :  { %v513_v49 = vadd.f32 %v508_v40, %v484_v48 }
 0x270   :  { %528 = vst.msk [vmem:[%s1060_s7 + $0x10] sm:$0xff] %vm525_vm1, %v511_v47 }
 0x271   :  { %530 = vst.msk [vmem:[%s1060_s7 + $0x20] sm:$0xff] %vm525_vm1, %v513_v49  ;;  %v486_v50 = vpop.xlane.xlu1 %485 }
 0x272   :  { %v514_v51 = vadd.f32 %v508_v40, %v486_v50  ;;  %v488_v52 = vpop.xlane.xlu0 %487 }
 0x273   :  { %v515_v53 = vadd.f32 %v508_v40, %v488_v52 }
 0x274   :  { %531 = vst.msk [vmem:[%s1060_s7 + $0x28] sm:$0xff] %vm525_vm1, %v514_v51 }
 0x275   :  { %532 = vst.msk [vmem:[%s1060_s7 + $0x30] sm:$0xff] %vm525_vm1, %v515_v53  ;;  %v490_v54 = vpop.xlane.xlu1 %489 }
 0x276   :  { %v516_v55 = vadd.f32 %v508_v40, %v490_v54  ;;  %v492_v56 = vpop.xlane.xlu0 %491 }
 0x277   :  { %v517_v57 = vadd.f32 %v508_v40, %v492_v56 }
 0x278   :  { %533 = vst.msk [vmem:[%s1060_s7 + $0x38] sm:$0xff] %vm525_vm1, %v516_v55 }
 0x279   :  { %534 = vst.msk [vmem:[%s1060_s7 + $0x40] sm:$0xff] %vm525_vm1, %v517_v57  ;;  %v494_v58 = vpop.xlane.xlu1 %493 }
 0x27a   :  { %v518_v59 = vadd.f32 %v508_v40, %v494_v58  ;;  %v496_v60 = vpop.xlane.xlu0 %495 }
 0x27b   :  { %v519_v61 = vadd.f32 %v508_v40, %v496_v60 }
 0x27c   :  { %535 = vst.msk [vmem:[%s1060_s7 + $0x48] sm:$0xff] %vm525_vm1, %v518_v59 }
 0x27d   :  { %536 = vst.msk [vmem:[%s1060_s7 + $0x50] sm:$0xff] %vm525_vm1, %v519_v61  ;;  %v498_v62 = vpop.xlane.xlu1 %497 }
 0x27e   :  { %v520_v63 = vadd.f32 %v508_v40, %v498_v62  ;;  %v500_v0 = vpop.xlane.xlu0 %499 }
 0x27f   :  { %v521_v1 = vadd.f32 %v508_v40, %v500_v0 }
 0x280   :  { %537 = vst.msk [vmem:[%s1060_s7 + $0x58] sm:$0xff] %vm525_vm1, %v520_v63 }
 0x281   :  { %538 = vst.msk [vmem:[%s1060_s7 + $0x60] sm:$0xff] %vm525_vm1, %v521_v1  ;;  %v502_v2 = vpop.xlane.xlu1 %501 }
 0x282   :  { %v522_v3 = vadd.f32 %v508_v40, %v502_v2  ;;  %v504_v4 = vpop.xlane.xlu0 %503 }
 0x283   :  { %v523_v5 = vadd.f32 %v508_v40, %v504_v4 }
 0x284   :  { %539 = vst.msk [vmem:[%s1060_s7 + $0x68] sm:$0xff] %vm525_vm1, %v522_v3 }
 0x285   :  { %540 = vst.msk [vmem:[%s1060_s7 + $0x70] sm:$0xff] %vm525_vm1, %v523_v5  ;;  %v506_v6 = vpop.xlane.xlu1 %505 }
 0x286   :  { %v524_v7 = vadd.f32 %v508_v40, %v506_v6 }
 0x288   :  { %541 = vst.msk [vmem:[%s1060_s7 + $0x78] sm:$0xff] %vm525_vm1, %v524_v7 }

</bundles_post_ra>
